<compile_context>
chip_gen: v7x
topology: tpu7x:2x2x1
jax: 0.10.0
libtpu: 0.0.40
codegen_flags: <defaults>
</compile_context>

<pallas_src>
import functools
import math
import random

import jax
import jax.numpy as jnp
from jax import lax
from jax.experimental import pallas as pl
from jax.experimental.pallas import tpu as pltpu


# ---------------------------------------------------------------------------
# Kernel 1: fused K|V projection (hoisted -- runs once per (batch, kv-tile)).
# ---------------------------------------------------------------------------
def _kv_proj_kernel(kvx_ref, wkv_ref, bkv_ref, k_ref, v_ref, *, D):
    x = kvx_ref[0]                                            # (TKV, D)  bf16
    kv = jnp.dot(x, wkv_ref[...],
                 preferred_element_type=jnp.float32) + bkv_ref[...]
    k_ref[0] = kv[:, :D].astype(k_ref.dtype)
    v_ref[0] = kv[:, D:].astype(v_ref.dtype)


# ---------------------------------------------------------------------------
# Kernel 2: per-(batch, query-tile) attention with 'stocastic' moderation.
# ---------------------------------------------------------------------------
def _attn_kernel(qx_ref, k_ref, v_ref, wq_ref, bq_ref, wl_ref, bl_ref,
                 rmask_ref, out_ref, headcat_ref, *,
                 heads, dk, k_top, boost_scale, n_bisect):
    qx = qx_ref[0]                                            # (TQ, D)   bf16
    Kb = k_ref[0]                                             # (Skv, D)  bf16
    Vb = v_ref[0]                                             # (Skv, D)  bf16

    # Q projection on the MXU.  1/sqrt(dk) is already folded into wq/bq on the
    # host, so no per-tile VPU scaling multiply is needed.
    Qb = (jnp.dot(qx, wq_ref[...], preferred_element_type=jnp.float32)
          + bq_ref[...]).astype(jnp.bfloat16)                 # (TQ, D)

    TQ = Qb.shape[0]
    Skv = Kb.shape[0]
    rand_boost = jnp.broadcast_to(rmask_ref[...] > 0.5, (TQ, Skv))   # hoisted

    for h in range(heads):                 # static loop; heads is small
        # NOTE: for dk < 128 these lane slices start at non-128-aligned
        # offsets (per-head relayout filler); prefer dk >= 128 if head dim is
        # a design knob.
        Qh = Qb[:, h * dk:(h + 1) * dk]                       # (TQ, dk)
        Kh = Kb[:, h * dk:(h + 1) * dk]                       # (Skv, dk)
        Vh = Vb[:, h * dk:(h + 1) * dk]                       # (Skv, dk)

        # scores = Qh @ Kh.T -- transpose folded into the contraction (MXU
        # native A.B^T form; check the bundle for vxpose only if this ever
        # becomes the bottleneck).
        scores = lax.dot_general(Qh, Kh, (((1,), (1,)), ((), ())),
                                 preferred_element_type=jnp.float32)

        # Numerically stable UNNORMALIZED softmax numerator.  max(e) == 1.0
        # exactly, which makes the first top-k iteration a free compare.
        m = jnp.max(scores, axis=-1, keepdims=True)
        e = jnp.exp(scores - m)

        # moderate_attention, mode='stocastic':
        #   top-k columns (k = round(0.05*Skv)) plus a fixed set of random
        #   columns are scaled by 1.2, then each row is renormalized.
        #   Selecting on unnormalized e gives the identical ordering as
        #   selecting on softmax(scores); the union scaling is idempotent.
        if k_top <= 0:
            boost = rand_boost
        elif k_top <= n_bisect:
            # Small k: exact iterative top-k (k_top row-max reductions, the
            # first skipped because max(e) == 1.0).
            hit = e >= 1.0
            boost = jnp.logical_or(rand_boost, hit)
            rem = jnp.where(hit, -jnp.inf, e)
            for _ in range(k_top - 1):
                mx = jnp.max(rem, axis=-1, keepdims=True)
                hit = rem >= mx
                boost = jnp.logical_or(boost, hit)
                rem = jnp.where(hit, -jnp.inf, rem)
        else:
            # Large k (long Skv): per-row threshold bisection on e in (0, 1].
            # O(n_bisect) row reductions regardless of k_top, so the top-k no
            # longer saturates the XLUs at Skv >= 1k.
            lo = jnp.zeros((TQ, 1), jnp.float32)
            hi = jnp.full((TQ, 1), 1.0 + 1e-6, jnp.float32)
            for _ in range(n_bisect):
                t = 0.5 * (lo + hi)
                cnt = jnp.sum((e >= t).astype(jnp.float32), axis=-1,
                              keepdims=True)
                ge = cnt >= float(k_top)
                lo = jnp.where(ge, t, lo)
                hi = jnp.where(ge, hi, t)
            boost = jnp.logical_or(rand_boost, e >= lo)

        # Single renormalization: scale boosted columns once, one row-sum, and
        # an EUP approx-reciprocal multiply instead of a VPU divide.
        e2 = e * jnp.where(boost, boost_scale, 1.0)
        denom = jnp.sum(e2, axis=-1, keepdims=True)
        p = (e2 * pl.reciprocal(denom, approx=True)).astype(jnp.bfloat16)

        # Per-head value matmul; the head output is stashed at its column
        # offset so the output projection below is ONE full-contraction
        # (TQ,D)x(D,D) GEMM instead of `heads` under-filled K=dk GEMMs.
        head_out = jnp.dot(p, Vh, preferred_element_type=jnp.float32)
        headcat_ref[:, h * dk:(h + 1) * dk] = head_out

    out = jnp.dot(headcat_ref[...].astype(jnp.bfloat16), wl_ref[...],
                  preferred_element_type=jnp.float32) + bl_ref[...]
    out_ref[0] = out.astype(out_ref.dtype)


def _pick_tile(n, target):
    """Largest multiple-of-8 divisor of n that is <= target (else n)."""
    for t in (1024, 512, 256, 128, 64, 32, 16, 8):
        if t <= target and n % t == 0:
            return t
    return n


def _device_defaults():
    """(q_tile_target, vmem_limit_bytes) tuned per TPU generation."""
    try:
        kind = jax.devices()[0].device_kind.lower()
    except Exception:
        kind = ""
    if "v7" in kind or "7x" in kind:
        # v7x: 64 MiB physical VMEM/TC -> small query tiles, tight budget.
        return 128, 40 * 1024 * 1024
    if any(tag in kind for tag in ("v4", "v5", "v6")):
        # 128 MiB VMEM: bigger lane-dense output tiles amortize the ~0.35 us
        # per-grid-step pipeline overhead and halve weight-revisit steps.
        return 512, 96 * 1024 * 1024
    return 256, 48 * 1024 * 1024


def multihead_attention(query_x, kv_x, params, rand_idx, heads,
                        boost_scale=1.2, top_p=0.05, q_tile=None, kv_tile=None,
                        vmem_limit_bytes=None, n_bisect=16,
                        out_dtype=jnp.float32):
    # TODO(synk): the optional boolean `mask` / train_decode_masking path is not
    # implemented (the reference forward is exercised with mask=None).
    B, Sq, D = query_x.shape
    _, Skv, _ = kv_x.shape
    dk = D // heads
    k_top = round(top_p * Skv)

    tq_target, vmem_default = _device_defaults()
    if vmem_limit_bytes is None:
        vmem_limit_bytes = vmem_default
    TQ = q_tile if q_tile is not None else _pick_tile(Sq, tq_target)
    TKV = kv_tile if kv_tile is not None else _pick_tile(Skv, 256)
    assert Sq % TQ == 0, "query tile must divide Sq"
    assert Skv % TKV == 0, "kv tile must divide Skv"

    wq, bq, wk, bk, wv, bv, wl, bl = params
    # nn.Linear is y = x @ W.T + b: pre-transpose on the host; fold the
    # 1/sqrt(dk) softmax scale into W_Q / b_Q (one-time constant weight fold,
    # not an activation pre-scale); fuse K|V into one (D, 2D) weight; cast all
    # pure-MXU operands to bf16 (f32 accumulation happens inside the kernels).
    inv_sqrt_dk = 1.0 / math.sqrt(dk)
    wq_t = (wq.T * inv_sqrt_dk).astype(jnp.bfloat16)
    bq2 = (bq * inv_sqrt_dk).reshape(1, D).astype(jnp.float32)
    wkv_t = jnp.concatenate([wk.T, wv.T], axis=1).astype(jnp.bfloat16)  # (D,2D)
    bkv2 = jnp.concatenate([bk, bv]).reshape(1, 2 * D).astype(jnp.float32)
    wl_t = wl.T.astype(jnp.bfloat16)
    bl2 = bl.reshape(1, D).astype(jnp.float32)

    # Fixed random-column mask (host-side draws, shared by every row/head/batch),
    # lane-dense (1, Skv) block.
    rmask = jnp.zeros((1, Skv), jnp.float32)
    if rand_idx:
        rmask = rmask.at[0, jnp.array(rand_idx, jnp.int32)].set(1.0)

    qx = query_x.astype(jnp.bfloat16)
    kvx = kv_x.astype(jnp.bfloat16)

    cparams = pltpu.CompilerParams(
        dimension_semantics=("parallel", "parallel"),
        vmem_limit_bytes=vmem_limit_bytes,
    )

    # --- Hoisted K/V projection: one pass over kv_x, bf16 K and V out -------
    K, V = pl.pallas_call(
        functools.partial(_kv_proj_kernel, D=D),
        out_shape=(jax.ShapeDtypeStruct((B, Skv, D), jnp.bfloat16),
                   jax.ShapeDtypeStruct((B, Skv, D), jnp.bfloat16)),
        grid=(B, Skv // TKV),
        in_specs=[
            pl.BlockSpec((1, TKV, D), lambda b, i: (b, i, 0)),
            pl.BlockSpec((D, 2 * D), lambda b, i: (0, 0)),
            pl.BlockSpec((1, 2 * D), lambda b, i: (0, 0)),
        ],
        out_specs=(pl.BlockSpec((1, TKV, D), lambda b, i: (b, i, 0)),
                   pl.BlockSpec((1, TKV, D), lambda b, i: (b, i, 0))),
        compiler_params=cparams,
    )(kvx, wkv_t, bkv2)

    # --- Attention over (batch, query-tile) grid ------------------------------
    kernel = functools.partial(_attn_kernel, heads=heads, dk=dk, k_top=k_top,
                               boost_scale=boost_scale, n_bisect=n_bisect)

    def const2d(shape):
        # Weights / biases / mask: same block every grid step (no re-DMA on
        # revisits).  TODO(synk): single-buffer these via
        # pipeline_mode=pl.Buffered(1) once verified on the target toolchain
        # to shave another ~4*D*D bytes of VMEM on v7x.
        return pl.BlockSpec(shape, lambda b, qi: (0, 0))

    return pl.pallas_call(
        kernel,
        out_shape=jax.ShapeDtypeStruct((B, Sq, D), out_dtype),
        grid=(B, Sq // TQ),
        in_specs=[
            pl.BlockSpec((1, TQ, D), lambda b, qi: (b, qi, 0)),   # query tile
            pl.BlockSpec((1, Skv, D), lambda b, qi: (b, 0, 0)),   # K (bf16)
            pl.BlockSpec((1, Skv, D), lambda b, qi: (b, 0, 0)),   # V (bf16)
            const2d((D, D)), const2d((1, D)),                     # W_Q, b_Q (scaled)
            const2d((D, D)), const2d((1, D)),                     # W_last, b_last
            const2d((1, Skv)),                                    # random-col mask
        ],
        out_specs=pl.BlockSpec((1, TQ, D), lambda b, qi: (b, qi, 0)),
        scratch_shapes=[pltpu.VMEM((TQ, D), jnp.float32)],        # head concat
        compiler_params=cparams,
    )(qx, K, V, wq_t, bq2, wl_t, bl2, rmask)


def ref_forward(query_x, kv_x, params, rand_idx, heads,
                boost_scale=1.2, top_p=0.05):
    """Pure-JAX f32 reference mirroring the PyTorch forward (mask=None)."""
    B, Sq, D = query_x.shape
    _, Skv, _ = kv_x.shape
    dk = D // heads
    k_top = round(top_p * Skv)
    wq, bq, wk, bk, wv, bv, wl, bl = params

    Q = query_x @ wq.T + bq
    K = kv_x @ wk.T + bk
    V = kv_x @ wv.T + bv

    def split_heads(X):  # torch: split(dk, -1) then cat(dim=0) -> per-head stack
        return jnp.stack([X[..., h * dk:(h + 1) * dk] for h in range(heads)],
                         axis=0)

    Qh, Kh, Vh = map(split_heads, (Q, K, V))            # (H, B, S, dk)
    scores = jnp.einsum('hbqd,hbkd->hbqk', Qh, Kh) / math.sqrt(dk)
    s = jax.nn.softmax(scores, axis=-1)

    rmask = jnp.zeros((Skv,), bool)
    if rand_idx:
        rmask = rmask.at[jnp.array(rand_idx)].set(True)

    sel = jnp.zeros(s.shape, bool)
    rem = s
    for _ in range(k_top):
        mx = jnp.max(rem, axis=-1, keepdims=True)
        hit = rem >= mx
        sel = sel | hit
        rem = jnp.where(hit, -jnp.inf, rem)
    boost = sel | rmask
    s2 = jnp.where(boost, s * boost_scale, s)
    s2 = s2 / jnp.sum(s2, axis=-1, keepdims=True)

    O = jnp.einsum('hbqk,hbkd->hbqd', s2, Vh)           # (H, B, Sq, dk)
    result = jnp.concatenate([O[h] for h in range(heads)], axis=-1)   # (B,Sq,D)
    return result @ wl.T + bl


if __name__ == "__main__":
    # Small but lane-dense shapes (D multiple of 128).
    B, S, D, H = 2, 128, 128, 4

    key = jax.random.PRNGKey(0)
    keys = jax.random.split(key, 10)
    init_bound = 1.0 / math.sqrt(D)

    def linear_params(kw, kb):
        w = jax.random.uniform(kw, (D, D), jnp.float32, -init_bound, init_bound)
        b = jax.random.uniform(kb, (D,), jnp.float32, -init_bound, init_bound)
        return w, b

    wq, bq = linear_params(keys[0], keys[1])
    wk, bk = linear_params(keys[2], keys[3])
    wv, bv = linear_params(keys[4], keys[5])
    wl, bl = linear_params(keys[6], keys[7])
    params = (wq, bq, wk, bk, wv, bv, wl, bl)

    query_x = jax.random.normal(keys[8], (B, S, D), jnp.float32)
    kv_x = jax.random.normal(keys[9], (B, S, D), jnp.float32)

    # Deterministic stand-in for torch's host-side random.randint draws in
    # 'stocastic' mode (rand_p = 0.1 of key length).
    random.seed(0)
    n_rand = round(0.1 * S)
    rand_idx = [random.randint(0, S - 1) for _ in range(n_rand)]

    # q_tile=64 exercises the query-tiling grid axis (grid = (B, 2)).
    out = multihead_attention(query_x, kv_x, params, rand_idx, H, q_tile=64)
    jax.block_until_ready(out)

    ref = ref_forward(query_x, kv_x, params, rand_idx, H)
    assert out.shape == (B, S, D)
    # Loose tolerance: kernel uses bf16 MXU operands (f32 accumulation) and an
    # approx reciprocal; a near-tie at the top-k boundary may select a
    # different (equally valid) column than the f32 reference.
    assert jnp.allclose(out, ref, atol=5e-2, rtol=5e-2), "mismatch vs JAX reference"

    print("KERNEL_OK")
</pallas_src>

<mosaic_0001>
module attributes {stable_mosaic.version = 11 : i64} {
  func.func @_kv_proj_kernel(%arg0: i32, %arg1: i32, %arg2: memref<1x128x128xbf16, #tpu.memory_space<vmem>>, %arg3: memref<128x256xbf16, #tpu.memory_space<vmem>>, %arg4: memref<1x256xf32, #tpu.memory_space<vmem>>, %arg5: memref<1x128x128xbf16, #tpu.memory_space<vmem>>, %arg6: memref<1x128x128xbf16, #tpu.memory_space<vmem>>) attributes {dimension_semantics = [#tpu.dimension_semantics<parallel>, #tpu.dimension_semantics<parallel>], iteration_bounds = array<i64: 2, 1>, scalar_prefetch = 0 : i64, scratch_operands = 0 : i64, tpu.core_type = #tpu.core_type<tc>, window_params = [{transform_indices = @transform_0, window_bounds = array<i64: 1, 128, 128>}, {pipeline_mode = #tpu.pipeline_mode<synchronous>, transform_indices = @transform_1, window_bounds = array<i64: 128, 256>}, {pipeline_mode = #tpu.pipeline_mode<synchronous>, transform_indices = @transform_2, window_bounds = array<i64: 1, 256>}, {transform_indices = @transform_3, window_bounds = array<i64: 1, 128, 128>}, {transform_indices = @transform_4, window_bounds = array<i64: 1, 128, 128>}]} {
    %c0 = arith.constant 0 : index
    %c0_0 = arith.constant 0 : index
    %c0_1 = arith.constant 0 : index
    %0 = vector.load %arg2[%c0, %c0_0, %c0_1] : memref<1x128x128xbf16, #tpu.memory_space<vmem>>, vector<1x128x128xbf16>
    %1 = vector.shape_cast %0 : vector<1x128x128xbf16> to vector<128x128xbf16>
    %c0_2 = arith.constant 0 : index
    %c0_3 = arith.constant 0 : index
    %2 = vector.load %arg3[%c0_2, %c0_3] : memref<128x256xbf16, #tpu.memory_space<vmem>>, vector<128x256xbf16>
    %cst = arith.constant dense<0.000000e+00> : vector<128x256xf32>
    %3 = tpu.matmul %1, %2, %cst {dimension_numbers = #tpu.dot_dimension_numbers<[1], [0], [0], [1], [0, 0, 1, 1], [], []>} : vector<128x128xbf16>, vector<128x256xbf16>, vector<128x256xf32> -> vector<128x256xf32>
    %c0_4 = arith.constant 0 : index
    %c0_5 = arith.constant 0 : index
    %4 = vector.load %arg4[%c0_4, %c0_5] : memref<1x256xf32, #tpu.memory_space<vmem>>, vector<1x256xf32>
    %5 = vector.broadcast %4 : vector<1x256xf32> to vector<128x256xf32>
    %6 = arith.addf %3, %5 : vector<128x256xf32>
    %7 = vector.extract_strided_slice %6 {offsets = [0, 0], sizes = [128, 128], strides = [1, 1]} : vector<128x256xf32> to vector<128x128xf32>
    %8 = arith.truncf %7 : vector<128x128xf32> to vector<128x128xbf16>
    %c0_6 = arith.constant 0 : index
    %c0_7 = arith.constant 0 : index
    %c0_8 = arith.constant 0 : index
    %9 = vector.load %arg5[%c0_6, %c0_7, %c0_8] : memref<1x128x128xbf16, #tpu.memory_space<vmem>>, vector<1x128x128xbf16>
    %10 = vector.shape_cast %9 : vector<1x128x128xbf16> to vector<128x128xbf16>
    %11 = vector.shape_cast %8 : vector<128x128xbf16> to vector<1x128x128xbf16>
    tpu.vector_store %arg5[%c0_6, %c0_7, %c0_8], %11 {strides = array<i32>} : memref<1x128x128xbf16, #tpu.memory_space<vmem>>, vector<1x128x128xbf16>,
    %12 = vector.extract_strided_slice %6 {offsets = [0, 128], sizes = [128, 128], strides = [1, 1]} : vector<128x256xf32> to vector<128x128xf32>
    %13 = arith.truncf %12 : vector<128x128xf32> to vector<128x128xbf16>
    %c0_9 = arith.constant 0 : index
    %c0_10 = arith.constant 0 : index
    %c0_11 = arith.constant 0 : index
    %14 = vector.load %arg6[%c0_9, %c0_10, %c0_11] : memref<1x128x128xbf16, #tpu.memory_space<vmem>>, vector<1x128x128xbf16>
    %15 = vector.shape_cast %14 : vector<1x128x128xbf16> to vector<128x128xbf16>
    %16 = vector.shape_cast %13 : vector<128x128xbf16> to vector<1x128x128xbf16>
    tpu.vector_store %arg6[%c0_9, %c0_10, %c0_11], %16 {strides = array<i32>} : memref<1x128x128xbf16, #tpu.memory_space<vmem>>, vector<1x128x128xbf16>,
    return
  }
  func.func @transform_0(%arg0: i32, %arg1: i32) -> (i32, i32, i32) {
    %c0_i32 = arith.constant 0 : i32
    %c0_i32_0 = arith.constant 0 : i32
    return %arg0, %arg1, %c0_i32 : i32, i32, i32
  }
  func.func @transform_1(%arg0: i32, %arg1: i32) -> (i32, i32) {
    %c0_i32 = arith.constant 0 : i32
    %c0_i32_0 = arith.constant 0 : i32
    %c0_i32_1 = arith.constant 0 : i32
    return %c0_i32, %c0_i32_0 : i32, i32
  }
  func.func @transform_2(%arg0: i32, %arg1: i32) -> (i32, i32) {
    %c0_i32 = arith.constant 0 : i32
    %c0_i32_0 = arith.constant 0 : i32
    %c0_i32_1 = arith.constant 0 : i32
    return %c0_i32, %c0_i32_0 : i32, i32
  }
  func.func @transform_3(%arg0: i32, %arg1: i32) -> (i32, i32, i32) {
    %c0_i32 = arith.constant 0 : i32
    %c0_i32_0 = arith.constant 0 : i32
    return %arg0, %arg1, %c0_i32 : i32, i32, i32
  }
  func.func @transform_4(%arg0: i32, %arg1: i32) -> (i32, i32, i32) {
    %c0_i32 = arith.constant 0 : i32
    %c0_i32_0 = arith.constant 0 : i32
    return %arg0, %arg1, %c0_i32 : i32, i32, i32
  }
}

</mosaic_0001>

<bundles_post_ra>
// kernel: tpu_custom_call.1
= control target key start
LH: loop header
LB: loop body
LE: loop exit
PB: predicated region body
PF: predicated region fallthrough
CT: control target
= control target key end

     0   :  { %10 = vsyncpa [#allocation3], 0  ;;  %s1775_s0 = inlined_call_operand.hbm [shape: bf16[2,128,128], index: 0, kind: input, shape index: {}]   ;;  %s1776_s1 = inlined_call_operand.hbm [shape: bf16[128,256], index: 1, kind: input, shape index: {}]   ;;  %s1777_s2 = inlined_call_operand.vmem [shape: f32[1,256], index: 2, kind: input, shape index: {}]   ;;  %s1778_s3 = inlined_call_operand.hbm [shape: bf16[2,128,128], index: 3, kind: output, shape index: {0}]   ;;  %s1779_s4 = inlined_call_operand.hbm [shape: bf16[2,128,128], index: 4, kind: output, shape index: {1}]  }
   0x1   :  { %12 = vsyncpa [#allocation3 + $0x1], 0 }
   0x2   :  { %13 = vsyncpa [#allocation6], 0 }
   0x3   :  { %14 = vsyncpa [#allocation4], 0 }
   0x4   :  { %16 = vsyncpa [#allocation4 + $0x1], 0 }
   0x5   :  { %17 = vsyncpa [#allocation9], 0 }
   0x6   :  { %19 = vsyncpa [#allocation9 + $0x1], 0  ;;  %s1435_s15 = smov 0   ;;  %s1437_s16 = smov 0  }
   0x7   :  { %s1439_s17 = smov 0   ;;  %s1441_s18 = smov 0  }
   0x8   :  { %s1443_s19 = smov 0   ;;  %s1445_s20 = smov 0  }
   0x9 LB: > { %s882_s21 = sadd.s32 4294967295, %s1397_s20   ;;  %s883_s22 = sadd.s32 4294967294, %s1397_s20   ;;  %s1397_s20 = sphi %s1445_s20, %s25_s20   ;;  %s1393_s19 = sphi %s1443_s19, %s1803_s19   ;;  %s1389_s18 = sphi %s1441_s18, %s1802_s18   ;;  %s1385_s17 = sphi %s1439_s17, %s1801_s17   ;;  %s1381_s16 = sphi %s1437_s16, %s1800_s16   ;;  %s1377_s15 = sphi %s1435_s15, %s1799_s15  }
   0xa   : > { %p59_p0 = scmp.ne.s32.totalorder %s1381_s16, %s1377_s15  ;;  %p1469_p1 = scmp.eq.s32.totalorder %s882_s21, 0 }
   0xb   : > { %p1473_p2 = scmp.eq.s32.totalorder %s882_s21, 1  ;;  %p133_p3 = scmp.eq.s32.totalorder %s883_s22, 1 }
   0xc   : > { %s1784_s23 = scalar_select %p1469_p1, 1, 0 }
   0xd   : > { %s1785_s24 = scalar_select %p1473_p2, 1, 0 }
   0xe   : > { %p1479_p4 = por %p1469_p1, %p59_p0  ;;  %p884_p5 = scmp.ge.s32.totalorder %s1397_s20, 1 }
   0xf   : > { %p1484_p6 = por %p133_p3, %p59_p0  ;;  %p168_p7 = scmp.lt.s32.totalorder %s1397_s20, 3 }
  0x10   : > { %s1786_s25 = scalar_select %p1479_p4, 1, 0 }
  0x11   : > { %s1787_s26 = scalar_select %p1484_p6, 1, 0 }
  0x12   : > { %p1489_p8 = pnand %p884_p5, %p168_p7  ;;  %s1399_s28 = smov [#allocation5]  }
  0x13   : > { %s180_s29 = sshll.u32 %s1399_s28, 4  ;;  %s37_s5 = sadd.s32 1, %s1393_s19  ;;  %s181_s29 = int_to_ptr.vmem [resolvable:$true] %s180_s29 }
  0x14   : > { %s1788_s27 = scalar_select %p1489_p8, 1, 0 }
  0x15   : > { %p1114_p9 = pneg %p1489_p8  ;;  %s1221_s8 = scalar_lea.hbm %s1776_s1, 2048 }
  0x16   : > { %p1222_p12 = scmp.ne.s32.totalorder %s1776_s1, %s1221_s8  ;;  %p1228_p5 = scmp.lt.u32.totalorder %s1221_s8, %s1776_s1 }
  0x17   : > { %p1498_p11 = pnand %p1114_p9, %p1469_p1 }
  0x19   : > { %p1223_p13 = pneg %p1498_p11 }
  0x1b   : > { %p1224_p0 = pnand %p1223_p13, %p1222_p12 }
  0x1d   : > { %p1225_p3 = pneg %p1224_p0 }
  0x1f   : > { %p1230_p7 = pnand %p1228_p5, %p1225_p3 }
  0x21   : > { %1233 = shalt.err (!%p1230_p7)
}
  0x22   : > { %s1234_s13 = scalar_lea.vmem %s181_s29, 2048  ;;  %p1242_p1 = scmp.lt.s32.totalorder %s181_s29, %s181_s29 }
  0x23   : > { %p1235_p9 = scmp.ne.s32.totalorder %s181_s29, %s1234_s13  ;;  %p1243_p4 = scmp.lt.s32.totalorder %s1234_s13, %s1234_s13 }
  0x25   : > { %p1237_p10 = pnand %p1235_p9, %p1223_p13  ;;  %p1244_p8 = por %p1243_p4, %p1242_p1 }
  0x27   : > { %p1238_p6 = pneg %p1237_p10 }
  0x29   : > { %p1245_p2 = pnand %p1244_p8, %p1238_p6 }
  0x2b   : > { %1248 = shalt.err (!%p1245_p2)
}
  0x2c   : > { %s1400_s14 = smov 128   ;;  %s1401_s21 = smov 8  }
  0x2d   : > { %1117 = dma.hbm_to_vmem [thread:$0]  (!%p1498_p11), %s1776_s1, 2048, %s181_s29, [#allocation6], %s1400_s14, %s1400_s14, %s1401_s21  }
  0x2e   : > { %p39_p1 = scmp.ge.s32.totalorder %s37_s5, 2  ;;  %s46_s6 = sadd.s32 1, %s1385_s17 }
  0x2f   : > { %p53_p2 = scmp.ne.s32.totalorder %s1385_s17, %s1381_s16  ;;  %p54_p4 = scmp.eq.s32.totalorder %s1397_s20, 0 }
  0x30   : > { %s1805_s5 = smov (%p39_p1, %s37_s5), 0  ;;  %p1791_p8 = scmp.ne.s32.totalorder %s1785_s24, 0 }
  0x31   : > { %p1525_p6 = por %p54_p4, %p53_p2  ;;  %s41_s30 = ssub.s32 %s1393_s19, %s1805_s5 }
  0x32   : > { %p1531_p10 = por %p1791_p8, %p53_p2  ;;  %p1130_p12 = scmp.lt.s32.totalorder %s1397_s20, 2 }
  0x33   : > { %p44_p11 = scmp.eq.s32.totalorder %s41_s30, 0  ;;  %s197_s29 = sand.u32 1, %s1385_s17  }
  0x34   : > { %s887_s9 = sshll.u32 %s197_s29, 6  ;;  %s959_s11 = sshll.u32 %s1393_s19, 10 }
  0x35   : > { %s1540_s10 = scalar_select %p44_p11, %s1385_s17, %s46_s6  }
  0x36   : > { %s1546_s14 = scalar_lea.hbm %s1775_s0, %s959_s11  ;;  %s201_s24 = scalar_lea.vmem [#allocation2], %s887_s9 }
  0x37   : > { %s210_s21 = sshll.u32 %s201_s24, 4  ;;  %p1552_p13 = pnand %p1130_p12, %p1525_p6  ;;  %s1548_s21 = int_to_ptr.vmem [resolvable:$true] %s210_s21 }
  0x38   : > { %s1556_s28 = scalar_lea.sflag [#allocation3], %s197_s29  ;;  %s1249_s6 = scalar_lea.hbm %s1546_s14, 1024 }
  0x39   : > { %p1250_p0 = scmp.ne.s32.totalorder %s1546_s14, %s1249_s6  ;;  %p1251_p3 = pneg %p1552_p13 }
  0x3a   : > { %s1254_s7 = scalar_lea.hbm %s1775_s0, 2048  ;;  %p1255_p9 = scmp.lt.u32.totalorder %s1546_s14, %s1775_s0 }
  0x3b   : > { %p1252_p5 = pnand %p1251_p3, %p1250_p0  ;;  %p1256_p1 = scmp.lt.u32.totalorder %s1254_s7, %s1249_s6 }
  0x3c   : > { %p1258_p4 = scmp.lt.u32.totalorder %s1249_s6, %s1546_s14 }
  0x3d   : > { %p1253_p7 = pneg %p1252_p5  ;;  %p1257_p2 = por %p1256_p1, %p1255_p9 }
  0x3f   : > { %p1259_p6 = por %p1258_p4, %p1257_p2 }
  0x41   : > { %p1260_p8 = pnand %p1259_p6, %p1253_p7 }
  0x43   : > { %1263 = shalt.err (!%p1260_p8)
}
  0x44   : > { %s1264_s29 = scalar_lea.vmem %s1548_s21, 1024  ;;  %s1402_s13 = smov [#allocation2]  }
  0x45   : > { %p1265_p12 = scmp.ne.s32.totalorder %s1548_s21, %s1264_s29  ;;  %s1269_s24 = sshll.u32 %s1402_s13, 4  ;;  %s1270_s24 = int_to_ptr.vmem [resolvable:$false] %s1269_s24 }
  0x46   : > { %s1271_s30 = scalar_lea.vmem %s1270_s24, 2048  ;;  %p1272_p5 = scmp.lt.s32.totalorder %s1548_s21, %s1270_s24 }
  0x47   : > { %p1267_p11 = pnand %p1265_p12, %p1251_p3  ;;  %p1273_p9 = scmp.lt.s32.totalorder %s1271_s30, %s1264_s29 }
  0x49   : > { %p1268_p0 = pneg %p1267_p11  ;;  %p1274_p1 = por %p1273_p9, %p1272_p5 }
  0x4b   : > { %p1275_p2 = pnand %p1274_p1, %p1268_p0 }
  0x4d   : > { %1278 = shalt.err (!%p1275_p2)
}
  0x4e   : > { %s1403_s6 = smov 64   ;;  %s1404_s9 = smov 4  }
  0x4f   : > { %1121 = dma.hbm_to_vmem [thread:$0]  (!%p1552_p13), %s1546_s14, 1024, %s1548_s21, %s1556_s28, %s1403_s6, %s1403_s6, %s1404_s9  }
  0x50   : > { %p1794_p3 = scmp.ne.s32.totalorder %s1788_s27, 0 }
  0x51   : > { %s1587_s7 = sand.u32 (!%p1794_p3), 1, %s1381_s16   ;;  %p1795_p7 = scmp.ne.s32.totalorder (!%p1794_p3), %s1786_s25, 0 }
  0x52   : > { %222 = sbr.rel (%p1794_p3) target bundleno = 408 (0x198), region = 32  ;;  %s1590_s11 = sshll.u32 (!%p1794_p3), %s1587_s7, 6 }
  0x53   : > { %s225_s12 = scalar_lea.sflag (!%p1794_p3), [#allocation3], %s1587_s7  ;;  %s1594_s29 = scalar_lea.vmem (!%p1794_p3), [#allocation2], %s1590_s11 }
  0x59   : > { %1360 = dma.done.wait (%p1795_p7), %s225_s12, 1024  }
  0x5a   : > { %1362 = vsyncadd (%p1795_p7), %s225_s12, 4294966272  ;;  %p1796_p13 = scmp.ne.s32.totalorder %s1784_s23, 0 }
  0x5c   : > { %1364 = dma.done.wait (%p1796_p13), [#allocation6], 2048  }
  0x5d   : > { %1366 = vsyncadd (%p1796_p13), [#allocation6], 4294965248  ;;  %v1405_v0 = vmov 0   ;;  %v1189_v1 = vld [vmem:[#allocation5 + $0x4] ss:$8 sps:$4 sm:$0xff]   ;;  %v1217_v21 = vld [vmem:[%s1594_s29 + $0x10] sm:$0xff]   ;;  %v300_v25 = vlaneseq }
  0x5e   : > { %470 = vmatprep.mubr.bf16.mxu0 %v1405_v0  ;;  %510 = vmatprep.mubr.bf16.mxu1 %v1405_v0  ;;  %v1191_v2 = vld [vmem:[#allocation5] ss:$8 sps:$4 sm:$0xff]   ;;  %v1192_v3 = vld [vmem:[#allocation5 + $0x14] ss:$8 sps:$4 sm:$0xff]   ;;  %v1194_v4 = vld [vmem:[#allocation5 + $0x10] ss:$8 sps:$4 sm:$0xff]  }
  0x5f   : > { %438 = vmatprep.subr.bf16.mxu0 %v1189_v1  ;;  %1088 = vmatprep.subr.bf16.mxu1 %v1189_v1  ;;  %v1195_v5 = vld [vmem:[#allocation5 + $0x24] ss:$8 sps:$4 sm:$0xff]   ;;  %v1197_v6 = vld [vmem:[#allocation5 + $0x20] ss:$8 sps:$4 sm:$0xff]   ;;  %v1198_v7 = vld [vmem:[#allocation5 + $0x34] ss:$8 sps:$4 sm:$0xff]  }
  0x60   : > { %439 = vmatpush1.bf16.msra.mxu0 %v1191_v2  ;;  %1096 = vmatpush1.bf16.msra.mxu1 %v1191_v2  ;;  %v1200_v8 = vld [vmem:[#allocation5 + $0x30] ss:$8 sps:$4 sm:$0xff]   ;;  %v1201_v9 = vld [vmem:[#allocation5 + $0x44] ss:$8 sps:$4 sm:$0xff]   ;;  %v1203_v10 = vld [vmem:[#allocation5 + $0x40] ss:$8 sps:$4 sm:$0xff]  }
  0x61   : > { %440 = vmatprep.subr.bf16.mxu0 %v1192_v3  ;;  %1089 = vmatprep.subr.bf16.mxu1 %v1192_v3  ;;  %v1204_v11 = vld [vmem:[#allocation5 + $0x54] ss:$8 sps:$4 sm:$0xff]   ;;  %v1206_v12 = vld [vmem:[#allocation5 + $0x50] ss:$8 sps:$4 sm:$0xff]   ;;  %v1207_v13 = vld [vmem:[#allocation5 + $0x64] ss:$8 sps:$4 sm:$0xff]  }
  0x62   : > { %v1209_v14 = vld [vmem:[#allocation5 + $0x60] ss:$8 sps:$4 sm:$0xff]   ;;  %v1210_v15 = vld [vmem:[#allocation5 + $0x74] ss:$8 sps:$4 sm:$0xff]   ;;  %v1212_v16 = vld [vmem:[#allocation5 + $0x70] ss:$8 sps:$4 sm:$0xff]  }
  0x63   : > { %v1213_v17 = vld [vmem:[%s1594_s29] sm:$0xff]   ;;  %v1215_v19 = vld [vmem:[%s1594_s29 + $0x8] sm:$0xff]   ;;  %v1218_v22 = vld [vmem:[%s1594_s29 + $0x30] sm:$0xff]   ;;  %v301_v26 = vshrl.u32 %v300_v25, 7  ;;  %s1636_s27 = scalar_lea.vmem [#allocation7], %s1590_s11  ;;  %s1641_s14 = scalar_lea.vmem [#allocation8], %s1590_s11 }
  0x64   : > { %441 = vmatpush1.bf16.msra.mxu0 %v1194_v4  ;;  %1097 = vmatpush1.bf16.msra.mxu1 %v1194_v4  ;;  %v1214_v18 = vld [vmem:[%s1594_s29 + $0x20] sm:$0xff]   ;;  %v1216_v20 = vld [vmem:[%s1594_s29 + $0x28] sm:$0xff]   ;;  %v1219_v23 = vld [vmem:[%s1594_s29 + $0x18] sm:$0xff]   ;;  %s732_s21 = sshll.u32 %s1636_s27, 4  ;;  %s750_s22 = sshll.u32 %s1641_s14, 4  ;;  %s1672_s21 = int_to_ptr.vmem [resolvable:$true] %s732_s21  ;;  %s1674_s22 = int_to_ptr.vmem [resolvable:$true] %s750_s22 }
  0x65   : > { %442 = vmatprep.subr.bf16.mxu0 %v1195_v5  ;;  %1090 = vmatprep.subr.bf16.mxu1 %v1195_v5  ;;  %v1220_v24 = vld [vmem:[%s1594_s29 + $0x38] sm:$0xff]   ;;  %v302_v27 = vsub.s32 0, %v301_v26  ;;  %v298_v28 = vld [vmem:[%s1777_s2] sm:$0x3]  ;;  %v306_v29 = vsub.s32 1, %v301_v26  ;;  %s992_s28 = sshll.u32 %s1389_s18, 10 }
  0x66   : > { %s1687_s24 = scalar_lea.hbm %s1778_s3, %s992_s28  ;;  %s1692_s9 = scalar_lea.hbm %s1779_s4, %s992_s28 }
  0x67   : > { %v1623_v30 = vrot.slane %v298_v28, %v302_v27  ;;  %v1625_v33 = vrot.slane %v298_v28, %v306_v29  ;;  %s712_s11 = scalar_lea.sflag [#allocation4], %s1587_s7  ;;  %s1279_s12 = scalar_lea.vmem %s1672_s21, 1024 }
  0x68   : > { %443 = vmatpush1.bf16.msra.mxu0 %v1197_v6  ;;  %1098 = vmatpush1.bf16.msra.mxu1 %v1197_v6  ;;  %p1280_p4 = scmp.ne.s32.totalorder %s1672_s21, %s1279_s12  ;;  %s1406_s29 = smov [#allocation7]  }
  0x69   : > { %444 = vmatprep.subr.bf16.mxu0 %v1198_v7  ;;  %1091 = vmatprep.subr.bf16.mxu1 %v1198_v7  ;;  %s1283_s23 = sshll.u32 %s1406_s29, 4  ;;  %s1284_s23 = int_to_ptr.vmem [resolvable:$false] %s1283_s23 }
  0x6a   : > { %p1281_p6 = pnand %p1280_p4, %p1531_p10  ;;  %s1285_s25 = scalar_lea.vmem %s1284_s23, 2048 }
  0x6b   : > { %p1286_p12 = scmp.lt.s32.totalorder %s1672_s21, %s1284_s23  ;;  %p1287_p11 = scmp.lt.s32.totalorder %s1285_s25, %s1279_s12 }
  0x6c   : > { %445 = vmatpush1.bf16.msra.mxu0 %v1200_v8  ;;  %1099 = vmatpush1.bf16.msra.mxu1 %v1200_v8  ;;  %p1282_p8 = pneg %p1281_p6 }
  0x6d   : > { %446 = vmatprep.subr.bf16.mxu0 %v1201_v9  ;;  %1092 = vmatprep.subr.bf16.mxu1 %v1201_v9  ;;  %p1288_p0 = por %p1287_p11, %p1286_p12 }
  0x6f   : > { %p1289_p5 = pnand %p1288_p0, %p1282_p8 }
  0x70   : > { %447 = vmatpush1.bf16.msra.mxu0 %v1203_v10  ;;  %1100 = vmatpush1.bf16.msra.mxu1 %v1203_v10 }
  0x71   : > { %448 = vmatprep.subr.bf16.mxu0 %v1204_v11  ;;  %1093 = vmatprep.subr.bf16.mxu1 %v1204_v11 }
  0x74   : > { %449 = vmatpush1.bf16.msra.mxu0 %v1206_v12  ;;  %1101 = vmatpush1.bf16.msra.mxu1 %v1206_v12 }
  0x75   : > { %450 = vmatprep.subr.bf16.mxu0 %v1207_v13  ;;  %1094 = vmatprep.subr.bf16.mxu1 %v1207_v13 }
  0x78   : > { %451 = vmatpush1.bf16.msra.mxu0 %v1209_v14  ;;  %1102 = vmatpush1.bf16.msra.mxu1 %v1209_v14 }
  0x79   : > { %452 = vmatprep.subr.bf16.mxu0 %v1210_v15  ;;  %1095 = vmatprep.subr.bf16.mxu1 %v1210_v15 }
  0x7c   : > { %453 = vmatpush1.bf16.msra.mxu0 %v1212_v16  ;;  %1103 = vmatpush1.bf16.msra.mxu1 %v1212_v16 }
  0x7f   : > { %471 = vmatmul.mubr.bf16.vlgmr.msra.gmra.mrb[0].mxu0 %v1213_v17  ;;  %511 = vmatmul.mubr.bf16.vlgmr.msra.gmra.mrb[0].mxu1 %v1214_v18 }
  0x80   : > { %480 = vmatprep.mubr.bf16.mxu0 %v1405_v0  ;;  %520 = vmatprep.mubr.bf16.mxu1 %v1405_v0 }
  0x87   : > { %481 = vmatmul.mubr.bf16.gmra.mrb[4].mxu0 %v1215_v19  ;;  %521 = vmatmul.mubr.bf16.gmra.mrb[4].mxu1 %v1216_v20 }
  0x88   : > { %490 = vmatprep.mubr.bf16.mxu0 %v1405_v0  ;;  %530 = vmatprep.mubr.bf16.mxu1 %v1405_v0 }
  0x8f   : > { %491 = vmatmul.mubr.bf16.gmra.mrb[8].mxu0 %v1217_v21  ;;  %531 = vmatmul.mubr.bf16.gmra.mrb[8].mxu1 %v1218_v22 }
  0x90   : > { %500 = vmatprep.mubr.bf16.mxu0 %v1405_v0  ;;  %540 = vmatprep.mubr.bf16.mxu1 %v1405_v0 }
  0x97   : > { %501 = vmatmul.mubr.bf16.gmra.mrb[12].mxu0 %v1219_v23  ;;  %541 = vmatmul.mubr.bf16.gmra.mrb[12].mxu1 %v1220_v24 }
 0x152   : > { %v472_v31 = vpop.f32.mrb[0].mxu0  ;;  %v512_v32 = vpop.f32.mrb[0].mxu1 }
 0x153   : > { %v474_v34 = vpop.f32.mrb[1].mxu0  ;;  %v514_v35 = vpop.f32.mrb[1].mxu1  ;;  %v473_v38 = vadd.f32 %v472_v31, %v1623_v30  ;;  %v513_v39 = vadd.f32 %v512_v32, %v1623_v30 }
 0x154   : > { %v476_v36 = vpop.f32.mrb[2].mxu0  ;;  %v516_v37 = vpop.f32.mrb[2].mxu1  ;;  %v475_v44 = vadd.f32 %v474_v34, %v1625_v33  ;;  %v515_v45 = vadd.f32 %v514_v35, %v1625_v33 }
 0x155   : > { %v477_v40 = vadd.f32 %v476_v36, %v1623_v30  ;;  %v517_v41 = vadd.f32 %v516_v37, %v1623_v30  ;;  %v478_v42 = vpop.f32.mrb[3].mxu0  ;;  %v518_v43 = vpop.f32.mrb[3].mxu1 }
 0x156   : > { %v479_v46 = vadd.f32 %v478_v42, %v1625_v33  ;;  %v519_v47 = vadd.f32 %v518_v43, %v1625_v33 }
 0x157   : > { %v997_v48 = vpack.c.bf16 %v477_v40, %v473_v38  ;;  %v1017_v49 = vpack.c.bf16 %v517_v41, %v513_v39 }
 0x158   : > { %v1037_v50 = vpack.c.bf16 %v479_v46, %v475_v44  ;;  %v1057_v51 = vpack.c.bf16 %v519_v47, %v515_v45 }
 0x159   : > { %998 = vst [vmem:[%s1636_s27] sm:$0xff] %v997_v48   ;;  %1077 = vst [vmem:[%s1636_s27 + $0x20] sm:$0xff] %v1017_v49  }
 0x15a   : > { %1038 = vst [vmem:[%s1641_s14] sm:$0xff] %v1037_v50   ;;  %1084 = vst [vmem:[%s1641_s14 + $0x20] sm:$0xff] %v1057_v51   ;;  %v482_v52 = vpop.f32.mrb[4].mxu0  ;;  %v522_v53 = vpop.f32.mrb[4].mxu1 }
 0x15b   : > { %v484_v54 = vpop.f32.mrb[5].mxu0  ;;  %v524_v55 = vpop.f32.mrb[5].mxu1  ;;  %v483_v58 = vadd.f32 %v482_v52, %v1623_v30  ;;  %v523_v59 = vadd.f32 %v522_v53, %v1623_v30 }
 0x15c   : > { %v486_v56 = vpop.f32.mrb[6].mxu0  ;;  %v526_v57 = vpop.f32.mrb[6].mxu1  ;;  %v485_v0 = vadd.f32 %v484_v54, %v1625_v33  ;;  %v525_v1 = vadd.f32 %v524_v55, %v1625_v33 }
 0x15d   : > { %v487_v60 = vadd.f32 %v486_v56, %v1623_v30  ;;  %v527_v61 = vadd.f32 %v526_v57, %v1623_v30  ;;  %v488_v62 = vpop.f32.mrb[7].mxu0  ;;  %v528_v63 = vpop.f32.mrb[7].mxu1 }
 0x15e   : > { %v489_v2 = vadd.f32 %v488_v62, %v1625_v33  ;;  %v529_v3 = vadd.f32 %v528_v63, %v1625_v33 }
 0x15f   : > { %v1002_v4 = vpack.c.bf16 %v487_v60, %v483_v58  ;;  %v1022_v5 = vpack.c.bf16 %v527_v61, %v523_v59 }
 0x160   : > { %v1042_v6 = vpack.c.bf16 %v489_v2, %v485_v0  ;;  %v1062_v7 = vpack.c.bf16 %v529_v3, %v525_v1 }
 0x161   : > { %1074 = vst [vmem:[%s1636_s27 + $0x8] sm:$0xff] %v1002_v4   ;;  %1078 = vst [vmem:[%s1636_s27 + $0x28] sm:$0xff] %v1022_v5  }
 0x162   : > { %1081 = vst [vmem:[%s1641_s14 + $0x8] sm:$0xff] %v1042_v6   ;;  %1085 = vst [vmem:[%s1641_s14 + $0x28] sm:$0xff] %v1062_v7   ;;  %v492_v8 = vpop.f32.mrb[8].mxu0  ;;  %v532_v9 = vpop.f32.mrb[8].mxu1 }
 0x163   : > { %v494_v10 = vpop.f32.mrb[9].mxu0  ;;  %v534_v11 = vpop.f32.mrb[9].mxu1  ;;  %v493_v14 = vadd.f32 %v492_v8, %v1623_v30  ;;  %v533_v15 = vadd.f32 %v532_v9, %v1623_v30 }
 0x164   : > { %v496_v12 = vpop.f32.mrb[10].mxu0  ;;  %v536_v13 = vpop.f32.mrb[10].mxu1  ;;  %v495_v20 = vadd.f32 %v494_v10, %v1625_v33  ;;  %v535_v21 = vadd.f32 %v534_v11, %v1625_v33 }
 0x165   : > { %v497_v16 = vadd.f32 %v496_v12, %v1623_v30  ;;  %v537_v17 = vadd.f32 %v536_v13, %v1623_v30  ;;  %v498_v18 = vpop.f32.mrb[11].mxu0  ;;  %v538_v19 = vpop.f32.mrb[11].mxu1 }
 0x166   : > { %v499_v22 = vadd.f32 %v498_v18, %v1625_v33  ;;  %v539_v23 = vadd.f32 %v538_v19, %v1625_v33 }
 0x167   : > { %v1007_v24 = vpack.c.bf16 %v497_v16, %v493_v14  ;;  %v1027_v25 = vpack.c.bf16 %v537_v17, %v533_v15 }
 0x168   : > { %v1047_v26 = vpack.c.bf16 %v499_v22, %v495_v20  ;;  %v1067_v27 = vpack.c.bf16 %v539_v23, %v535_v21 }
 0x169   : > { %1075 = vst [vmem:[%s1636_s27 + $0x10] sm:$0xff] %v1007_v24   ;;  %1079 = vst [vmem:[%s1636_s27 + $0x30] sm:$0xff] %v1027_v25  }
 0x16a   : > { %1082 = vst [vmem:[%s1641_s14 + $0x10] sm:$0xff] %v1047_v26   ;;  %1086 = vst [vmem:[%s1641_s14 + $0x30] sm:$0xff] %v1067_v27   ;;  %v502_v28 = vpop.f32.mrb[12].mxu0  ;;  %v542_v29 = vpop.f32.mrb[12].mxu1 }
 0x16b   : > { %v504_v31 = vpop.f32.mrb[13].mxu0  ;;  %v544_v32 = vpop.f32.mrb[13].mxu1  ;;  %v503_v36 = vadd.f32 %v502_v28, %v1623_v30  ;;  %v543_v37 = vadd.f32 %v542_v29, %v1623_v30 }
 0x16c   : > { %v506_v34 = vpop.f32.mrb[14].mxu0  ;;  %v546_v35 = vpop.f32.mrb[14].mxu1  ;;  %v505_v42 = vadd.f32 %v504_v31, %v1625_v33  ;;  %v545_v43 = vadd.f32 %v544_v32, %v1625_v33 }
 0x16d   : > { %v507_v38 = vadd.f32 %v506_v34, %v1623_v30  ;;  %v547_v39 = vadd.f32 %v546_v35, %v1623_v30  ;;  %v508_v40 = vpop.f32.mrb[15].mxu0  ;;  %v548_v41 = vpop.f32.mrb[15].mxu1 }
 0x16e   : > { %v509_v44 = vadd.f32 %v508_v40, %v1625_v33  ;;  %v549_v45 = vadd.f32 %v548_v41, %v1625_v33 }
 0x16f   : > { %v1012_v30 = vpack.c.bf16 %v507_v38, %v503_v36  ;;  %v1032_v46 = vpack.c.bf16 %v547_v39, %v543_v37 }
 0x170   : > { %v1052_v47 = vpack.c.bf16 %v509_v44, %v505_v42  ;;  %v1072_v48 = vpack.c.bf16 %v549_v45, %v545_v43 }
 0x171   : > { %1076 = vst [vmem:[%s1636_s27 + $0x18] sm:$0xff] %v1012_v30   ;;  %1080 = vst [vmem:[%s1636_s27 + $0x38] sm:$0xff] %v1032_v46  }
 0x172   : > { %1083 = vst [vmem:[%s1641_s14 + $0x18] sm:$0xff] %v1052_v47   ;;  %1087 = vst [vmem:[%s1641_s14 + $0x38] sm:$0xff] %v1072_v48  }
 0x173   : > { %1292 = shalt.err (!%p1289_p5)
}
 0x174   : > { %s1293_s27 = scalar_lea.hbm %s1687_s24, 1024  ;;  %s1297_s18 = scalar_lea.hbm %s1778_s3, 2048 }
 0x175   : > { %p1294_p9 = scmp.ne.s32.totalorder %s1687_s24, %s1293_s27  ;;  %p1298_p3 = scmp.lt.u32.totalorder %s1687_s24, %s1778_s3 }
 0x176   : > { %p1299_p7 = scmp.lt.u32.totalorder %s1297_s18, %s1293_s27  ;;  %p1301_p4 = scmp.lt.u32.totalorder %s1293_s27, %s1687_s24 }
 0x177   : > { %p1295_p1 = pnand %p1294_p9, %p1531_p10 }
 0x178   : > { %p1300_p13 = por %p1299_p7, %p1298_p3 }
 0x179   : > { %p1296_p2 = pneg %p1295_p1 }
 0x17a   : > { %p1302_p6 = por %p1301_p4, %p1300_p13 }
 0x17c   : > { %p1303_p8 = pnand %p1302_p6, %p1296_p2 }
 0x17e   : > { %1306 = shalt.err (!%p1303_p8)
}
 0x17f   : > { %s1407_s6 = smov 64   ;;  %s1408_s12 = smov 4  }
 0x180   : > { %1110 = dma.vmem_to_hbm [thread:$0]  (%p1531_p10), %s1672_s21, 1024, %s1687_s24, %s712_s11, %s1407_s6, %s1407_s6, %s1408_s12  }
 0x181   : > { %s717_s29 = scalar_lea.sflag [#allocation9], %s1587_s7  ;;  %s1307_s23 = scalar_lea.vmem %s1674_s22, 1024 }
 0x182   : > { %p1308_p12 = scmp.ne.s32.totalorder %s1674_s22, %s1307_s23  ;;  %s1409_s25 = smov [#allocation8]  }
 0x183   : > { %s1311_s27 = sshll.u32 %s1409_s25, 4  ;;  %s1312_s27 = int_to_ptr.vmem [resolvable:$false] %s1311_s27 }
 0x184   : > { %p1309_p11 = pnand %p1308_p12, %p1531_p10  ;;  %s1313_s14 = scalar_lea.vmem %s1312_s27, 2048 }
 0x185   : > { %p1314_p5 = scmp.lt.s32.totalorder %s1674_s22, %s1312_s27  ;;  %p1315_p9 = scmp.lt.s32.totalorder %s1313_s14, %s1307_s23 }
 0x186   : > { %p1310_p0 = pneg %p1309_p11 }
 0x187   : > { %p1316_p1 = por %p1315_p9, %p1314_p5 }
 0x189   : > { %p1317_p2 = pnand %p1316_p1, %p1310_p0 }
 0x18b   : > { %1320 = shalt.err (!%p1317_p2)
}
 0x18c   : > { %s1321_s21 = scalar_lea.hbm %s1692_s9, 1024  ;;  %s1325_s28 = scalar_lea.hbm %s1779_s4, 2048 }
 0x18d   : > { %p1322_p3 = scmp.ne.s32.totalorder %s1692_s9, %s1321_s21  ;;  %p1326_p4 = scmp.lt.u32.totalorder %s1692_s9, %s1779_s4 }
 0x18e   : > { %p1327_p6 = scmp.lt.u32.totalorder %s1325_s28, %s1321_s21  ;;  %p1329_p12 = scmp.lt.u32.totalorder %s1321_s21, %s1692_s9 }
 0x18f   : > { %p1323_p7 = pnand %p1322_p3, %p1531_p10 }
 0x190   : > { %p1328_p8 = por %p1327_p6, %p1326_p4 }
 0x191   : > { %p1324_p13 = pneg %p1323_p7 }
 0x192   : > { %p1330_p11 = por %p1329_p12, %p1328_p8 }
 0x194   : > { %p1331_p0 = pnand %p1330_p11, %p1324_p13 }
 0x196   : > { %1334 = shalt.err (!%p1331_p0)
}
 0x197   : > { %1111 = dma.vmem_to_hbm [thread:$0]  (%p1531_p10), %s1674_s22, 1024, %s1692_s9, %s717_s29, %s1407_s6, %s1407_s6, %s1408_s12  }
 0x198 PF: > { %s765_s30 = sand.u32 1, %s1377_s15   ;;  %p1797_p5 = scmp.ne.s32.totalorder %s1787_s26, 0 }
 0x199   : > { %p1798_p9 = scmp.ge.s32.totalorder %s1397_s20, 2  ;;  %s766_s23 = scalar_lea.sflag [#allocation4], %s765_s30 }
 0x19b   : > { %p1123_p1 = pnand %p1798_p9, %p1797_p5 }
 0x19d   : > { %1368 = dma.done.wait (!%p1123_p1), %s766_s23, 1024  }
 0x19e   : > { %1370 = vsyncadd (!%p1123_p1), %s766_s23, 4294966272  ;;  %s775_s8 = scalar_lea.sflag [#allocation9], %s765_s30 }
 0x19f   : > { %1372 = dma.done.wait (!%p1123_p1), %s775_s8, 1024  }
 0x1a0   : > { %1374 = vsyncadd (!%p1123_p1), %s775_s8, 4294966272  ;;  %s25_s20 = sadd.s32 1, %s1397_s20   ;;  %s1799_s15 = smov %s1381_s16 }
 0x1a1   : > { %p22_p2 = scmp.ge.s32.totalorder %s25_s20, 4   ;;  %s1800_s16 = smov %s1385_s17 }
 0x1a2   : > { %s1801_s17 = smov %s1540_s10  ;;  %s1802_s18 = smov %s1393_s19 }
 0x1a3   : > { %s1803_s19 = smov %s1805_s5  ;;  %24 = sbr.rel (!%p22_p2) target bundleno = 9 (0x9), region = 98 }
 0x1aa   :  { %780 = vsyncpa [#allocation3], 1 }
 0x1ab   :  { %782 = vsyncpa [#allocation3 + $0x1], 1 }
 0x1ac   :  { %783 = vsyncpa [#allocation6], 1 }
 0x1ad   :  { %784 = vsyncpa [#allocation4], 1 }
 0x1ae   :  { %786 = vsyncpa [#allocation4 + $0x1], 1 }
 0x1af   :  { %787 = vsyncpa [#allocation9], 1 }
 0x1b0   :  { %789 = vsyncpa [#allocation9 + $0x1], 1 }

</bundles_post_ra>
